<compile_context>
chip_gen: v7x
topology: tpu7x:2x2x1
jax: 0.10.0
libtpu: 0.0.40
codegen_flags: <defaults>
</compile_context>

<pallas_src>
import functools

import jax
import jax.numpy as jnp
from jax import lax
from jax.experimental import pallas as pl
from jax.experimental.pallas import tpu as pltpu

EPS = 1e-5
_LANES = 128
_TARGET_BLOCK_BYTES = 2 * 1024 * 1024   # ~2 MiB input block: <=~8 MiB live with double
                                        # buffering in the apply pass -> fits every gen
_VMEM_LIMIT = 32 * 1024 * 1024
_STATS_SPLITS = 2                       # shard the reduction across 2 TCs (v7x megacore)


# ---------------------------------------------------------------------------
# Kernel 1: per-lane sum / sum-of-squares reduction over the (packed) row axis.
# Grid = (core_split, row_tile); each split owns its own (1,1,Cp) accumulator
# block (reduction axis innermost / "arbitrary", split axis "parallel").
# ---------------------------------------------------------------------------
def _bn_stats_kernel(x_ref, sum_ref, sq_ref, *, tile_rows, valid_rows, tiles_per_split):
    s = pl.program_id(0)
    j = pl.program_id(1)

    @pl.when(j == 0)
    def _():
        sum_ref[...] = jnp.zeros_like(sum_ref)
        sq_ref[...] = jnp.zeros_like(sq_ref)

    x = x_ref[...].astype(jnp.float32)
    # Mask rows past the logical end: covers the partial tail tile and the fully
    # out-of-range (clamped, re-read) tiles that appear when the tile count is not
    # a multiple of the core split.
    row0 = (s * tiles_per_split + j) * tile_rows
    rows = row0 + lax.broadcasted_iota(jnp.int32, x.shape, 0)
    x = jnp.where(rows < valid_rows, x, 0.0)

    sum_ref[0] += jnp.sum(x, axis=0, keepdims=True)
    sq_ref[0] += jnp.sum(x * x, axis=0, keepdims=True)


# ---------------------------------------------------------------------------
# Kernel 2: fused elementwise normalize:  y = x * scale + shift
# (scale = gamma / sqrt(var + eps), shift = beta - mean * scale), lane-packed.
# ---------------------------------------------------------------------------
def _bn_apply_kernel(x_ref, scale_ref, shift_ref, o_ref):
    x = x_ref[...].astype(jnp.float32)
    o_ref[...] = (x * scale_ref[...] + shift_ref[...]).astype(o_ref.dtype)


def _pack_factor(rows: int, c: int) -> int:
    """Largest power-of-two p with p | rows and c*p <= 128 (only when c | 128)."""
    if c >= _LANES or _LANES % c != 0:
        return 1
    p = _LANES // c                      # divisors of 128 -> p is a power of two
    while p > 1 and rows % p != 0:
        p //= 2
    return p


def _choose_row_tile(rp: int, cp: int, itemsize: int):
    """Row tile ~_TARGET_BLOCK_BYTES, respecting (8/16/32, 128) sublane packing."""
    sub = max(8, 32 // itemsize)         # 8 for f32, 16 for bf16, 32 for int8/fp8
    t = max(sub, (_TARGET_BLOCK_BYTES // (cp * itemsize)) // sub * sub)
    if rp <= t:
        return rp, 1                     # single full-dim block (legal for any rp)
    return t, pl.cdiv(rp, t)


def _batchnorm_2d(x2d: jnp.ndarray, gamma: jnp.ndarray, beta: jnp.ndarray) -> jnp.ndarray:
    rows, c = x2d.shape
    itemsize = jnp.dtype(x2d.dtype).itemsize

    # --- lane-pack channels: contiguous view [rows, c] -> [rows/pack, c*pack] ----
    pack = _pack_factor(rows, c)
    rp, cp = rows // pack, c * pack
    xp = x2d.reshape(rp, cp)

    tile, nt = _choose_row_tile(rp, cp, itemsize)
    splits = _STATS_SPLITS if nt >= _STATS_SPLITS else 1
    tps = pl.cdiv(nt, splits)            # row tiles per core split

    # ---------------- pass 1: per-lane sum / sum of squares ---------------------
    def x_map(s, j):
        # clamp fully out-of-range tile indices (their rows are masked in-kernel)
        return (jnp.minimum(s * tps + j, nt - 1), 0)

    part_sum, part_sq = pl.pallas_call(
        functools.partial(_bn_stats_kernel, tile_rows=tile, valid_rows=rp,
                          tiles_per_split=tps),
        out_shape=(jax.ShapeDtypeStruct((splits, 1, cp), jnp.float32),
                   jax.ShapeDtypeStruct((splits, 1, cp), jnp.float32)),
        grid_spec=pltpu.PrefetchScalarGridSpec(
            num_scalar_prefetch=0,
            grid=(splits, tps),
            in_specs=[pl.BlockSpec((tile, cp), x_map)],
            out_specs=(pl.BlockSpec((1, 1, cp), lambda s, j: (s, 0, 0)),
                       pl.BlockSpec((1, 1, cp), lambda s, j: (s, 0, 0))),
        ),
        compiler_params=pltpu.CompilerParams(
            dimension_semantics=("parallel", "arbitrary"),
            vmem_limit_bytes=_VMEM_LIMIT),
        cost_estimate=pl.CostEstimate(
            flops=3 * rows * c, transcendentals=0,
            bytes_accessed=rows * c * itemsize + 2 * splits * cp * 4),
    )(xp)

    # --- tiny per-channel finalize (XLA glue on (pack, c)-sized arrays) ----------
    # TODO(synk): could be fused into the apply kernel (pl.when(program_id==0) into a
    # VMEM scratch) to shave a few tiny ops / one small HBM round-trip for tiny R.
    sum_c = part_sum.sum(axis=(0, 1)).reshape(pack, c).sum(axis=0)
    sq_c = part_sq.sum(axis=(0, 1)).reshape(pack, c).sum(axis=0)
    n = jnp.float32(rows)
    mean = sum_c / n
    var = jnp.maximum(sq_c / n - mean * mean, 0.0)   # biased variance, clamped >= 0
    rstd = lax.rsqrt(var + EPS)
    scale = gamma.astype(jnp.float32) * rstd          # (c,)
    shift = beta.astype(jnp.float32) - mean * scale   # (c,)
    scale_p = jnp.tile(scale, pack).reshape(1, cp)    # replicate across pack groups
    shift_p = jnp.tile(shift, pack).reshape(1, cp)

    # ---------------- pass 2: y = x * scale + shift ------------------------------
    y = pl.pallas_call(
        _bn_apply_kernel,
        out_shape=jax.ShapeDtypeStruct((rp, cp), x2d.dtype),
        grid_spec=pltpu.PrefetchScalarGridSpec(
            num_scalar_prefetch=0,
            grid=(nt,),
            in_specs=[pl.BlockSpec((tile, cp), lambda i: (i, 0)),
                      pl.BlockSpec((1, cp), lambda i: (0, 0)),
                      pl.BlockSpec((1, cp), lambda i: (0, 0))],
            out_specs=pl.BlockSpec((tile, cp), lambda i: (i, 0)),
        ),
        compiler_params=pltpu.CompilerParams(
            dimension_semantics=("parallel",),
            vmem_limit_bytes=_VMEM_LIMIT),
        cost_estimate=pl.CostEstimate(
            flops=2 * rows * c, transcendentals=0,
            bytes_accessed=2 * rows * c * itemsize),
    )(xp, scale_p, shift_p)
    return y.reshape(rows, c)


def point_batch_norm(x: jnp.ndarray, gamma: jnp.ndarray, beta: jnp.ndarray) -> jnp.ndarray:
    """Forward of PointBatchNorm. x is [B*N, C] or [B*N, L, C]."""
    if x.ndim == 3:
        m, l, c = x.shape
        y = _batchnorm_2d(x.reshape(m * l, c), gamma, beta)
        return y.reshape(m, l, c)
    elif x.ndim == 2:
        return _batchnorm_2d(x, gamma, beta)
    else:
        raise NotImplementedError


def _reference(x, gamma, beta):
    # pure-JAX reference for sanity checking
    if x.ndim == 3:
        m, l, c = x.shape
        flat = x.reshape(m * l, c).astype(jnp.float32)
    else:
        flat = x.astype(jnp.float32)
    mean = flat.mean(axis=0)
    var = flat.var(axis=0)
    y = (flat - mean) * jax.lax.rsqrt(var + EPS) * gamma + beta
    return y.reshape(x.shape).astype(x.dtype)


if __name__ == "__main__":
    key = jax.random.PRNGKey(0)
    k1, k2, k3, k4, k5 = jax.random.split(key, 5)

    C = 32
    # BatchNorm1d affine params (torch default gamma=1, beta=0; perturbed slightly
    # so the affine path is exercised).
    gamma = jnp.ones((C,), jnp.float32) + 0.01 * jax.random.normal(k3, (C,))
    beta = 0.01 * jax.random.normal(k4, (C,))

    # 2-D case: [B*N, C]
    x2d = jax.random.normal(k1, (64, C), jnp.float32)
    y2d = jax.block_until_ready(point_batch_norm(x2d, gamma, beta))

    # 3-D case: [B*N, L, C]
    x3d = jax.random.normal(k2, (4, 8, C), jnp.float32)
    y3d = jax.block_until_ready(point_batch_norm(x3d, gamma, beta))

    # larger ragged case: exercises lane-packing, multi-tile grid, 2-way core split
    # of the stats reduction, and the masked partial tail tile.
    x_big = jax.random.normal(k5, (16400, C), jnp.float32)
    y_big = jax.block_until_ready(point_batch_norm(x_big, gamma, beta))

    ok = (
        bool(jnp.allclose(y2d, _reference(x2d, gamma, beta), atol=1e-4, rtol=1e-4))
        and bool(jnp.allclose(y3d, _reference(x3d, gamma, beta), atol=1e-4, rtol=1e-4))
        and bool(jnp.allclose(y_big, _reference(x_big, gamma, beta), atol=1e-4, rtol=1e-4))
    )
    assert ok, "mismatch vs reference"
    print("KERNEL_OK")
</pallas_src>

<mosaic_0001>
module attributes {stable_mosaic.version = 11 : i64} {
  func.func @_bn_stats_kernel(%arg0: i32, %arg1: i32, %arg2: memref<16x128xf32, #tpu.memory_space<vmem>>, %arg3: memref<1x1x128xf32, #tpu.memory_space<vmem>>, %arg4: memref<1x1x128xf32, #tpu.memory_space<vmem>>) attributes {dimension_semantics = [#tpu.dimension_semantics<parallel>, #tpu.dimension_semantics<arbitrary>], iteration_bounds = array<i64: 1, 1>, scalar_prefetch = 0 : i64, scratch_operands = 0 : i64, tpu.core_type = #tpu.core_type<tc>, window_params = [{transform_indices = @transform_0, window_bounds = array<i64: 16, 128>}, {transform_indices = @transform_1, window_bounds = array<i64: 1, 1, 128>}, {transform_indices = @transform_2, window_bounds = array<i64: 1, 1, 128>}]} {
    %c0_i32 = arith.constant 0 : i32
    %0 = arith.cmpi eq, %arg1, %c0_i32 : i32
    %1 = arith.extui %0 : i1 to i32
    %c0_i32_0 = arith.constant 0 : i32
    %2 = arith.cmpi ne, %1, %c0_i32_0 : i32
    scf.if %2 {
      %cst_17 = arith.constant 0.000000e+00 : f32
      %31 = vector.broadcast %cst_17 : f32 to vector<1x1x128xf32>
      %c0_18 = arith.constant 0 : index
      %c0_19 = arith.constant 0 : index
      %c0_20 = arith.constant 0 : index
      %32 = vector.load %arg3[%c0_18, %c0_19, %c0_20] : memref<1x1x128xf32, #tpu.memory_space<vmem>>, vector<1x1x128xf32>
      tpu.vector_store %arg3[%c0_18, %c0_19, %c0_20], %31 {strides = array<i32>} : memref<1x1x128xf32, #tpu.memory_space<vmem>>, vector<1x1x128xf32>,
      %cst_21 = arith.constant 0.000000e+00 : f32
      %33 = vector.broadcast %cst_21 : f32 to vector<1x1x128xf32>
      %c0_22 = arith.constant 0 : index
      %c0_23 = arith.constant 0 : index
      %c0_24 = arith.constant 0 : index
      %34 = vector.load %arg4[%c0_22, %c0_23, %c0_24] : memref<1x1x128xf32, #tpu.memory_space<vmem>>, vector<1x1x128xf32>
      tpu.vector_store %arg4[%c0_22, %c0_23, %c0_24], %33 {strides = array<i32>} : memref<1x1x128xf32, #tpu.memory_space<vmem>>, vector<1x1x128xf32>,
    } else {
    }
    %c0 = arith.constant 0 : index
    %c0_1 = arith.constant 0 : index
    %3 = vector.load %arg2[%c0, %c0_1] : memref<16x128xf32, #tpu.memory_space<vmem>>, vector<16x128xf32>
    %c1_i32 = arith.constant 1 : i32
    %4 = arith.muli %arg0, %c1_i32 : i32
    %5 = arith.addi %4, %arg1 : i32
    %c16_i32 = arith.constant 16 : i32
    %6 = arith.muli %5, %c16_i32 : i32
    %7 = tpu.iota {dimensions = array<i32: 0>} : vector<16x128xi32>
    %8 = vector.broadcast %6 : i32 to vector<16x128xi32>
    %9 = arith.addi %8, %7 : vector<16x128xi32>
    %c16_i32_2 = arith.constant 16 : i32
    %10 = vector.broadcast %c16_i32_2 : i32 to vector<16x128xi32>
    %11 = arith.cmpi slt, %9, %10 : vector<16x128xi32>
    %cst = arith.constant 0.000000e+00 : f32
    %12 = vector.broadcast %cst : f32 to vector<16x128xf32>
    %13 = arith.select %11, %3, %12 : vector<16x128xi1>, vector<16x128xf32>
    %c0_3 = arith.constant 0 : index
    %c0_4 = arith.constant 0 : index
    %c0_5 = arith.constant 0 : index
    %14 = vector.load %arg3[%c0_3, %c0_4, %c0_5] : memref<1x1x128xf32, #tpu.memory_space<vmem>>, vector<1x1x128xf32>
    %15 = vector.shape_cast %14 : vector<1x1x128xf32> to vector<1x128xf32>
    %cst_6 = arith.constant dense<0.000000e+00> : vector<128xf32>
    %16 = vector.multi_reduction <add>, %13, %cst_6 [0] : vector<16x128xf32> to vector<128xf32>
    %17 = vector.shape_cast %16 : vector<128xf32> to vector<1x128xf32>
    %18 = arith.addf %15, %17 : vector<1x128xf32>
    %c0_7 = arith.constant 0 : index
    %c0_8 = arith.constant 0 : index
    %c0_9 = arith.constant 0 : index
    %19 = vector.load %arg3[%c0_7, %c0_8, %c0_9] : memref<1x1x128xf32, #tpu.memory_space<vmem>>, vector<1x1x128xf32>
    %20 = vector.shape_cast %19 : vector<1x1x128xf32> to vector<1x128xf32>
    %21 = vector.shape_cast %18 : vector<1x128xf32> to vector<1x1x128xf32>
    tpu.vector_store %arg3[%c0_7, %c0_8, %c0_9], %21 {strides = array<i32>} : memref<1x1x128xf32, #tpu.memory_space<vmem>>, vector<1x1x128xf32>,
    %c0_10 = arith.constant 0 : index
    %c0_11 = arith.constant 0 : index
    %c0_12 = arith.constant 0 : index
    %22 = vector.load %arg4[%c0_10, %c0_11, %c0_12] : memref<1x1x128xf32, #tpu.memory_space<vmem>>, vector<1x1x128xf32>
    %23 = vector.shape_cast %22 : vector<1x1x128xf32> to vector<1x128xf32>
    %24 = arith.mulf %13, %13 : vector<16x128xf32>
    %cst_13 = arith.constant dense<0.000000e+00> : vector<128xf32>
    %25 = vector.multi_reduction <add>, %24, %cst_13 [0] : vector<16x128xf32> to vector<128xf32>
    %26 = vector.shape_cast %25 : vector<128xf32> to vector<1x128xf32>
    %27 = arith.addf %23, %26 : vector<1x128xf32>
    %c0_14 = arith.constant 0 : index
    %c0_15 = arith.constant 0 : index
    %c0_16 = arith.constant 0 : index
    %28 = vector.load %arg4[%c0_14, %c0_15, %c0_16] : memref<1x1x128xf32, #tpu.memory_space<vmem>>, vector<1x1x128xf32>
    %29 = vector.shape_cast %28 : vector<1x1x128xf32> to vector<1x128xf32>
    %30 = vector.shape_cast %27 : vector<1x128xf32> to vector<1x1x128xf32>
    tpu.vector_store %arg4[%c0_14, %c0_15, %c0_16], %30 {strides = array<i32>} : memref<1x1x128xf32, #tpu.memory_space<vmem>>, vector<1x1x128xf32>,
    return
  }
  func.func @transform_0(%arg0: i32, %arg1: i32) -> (i32, i32) {
    %c1_i32 = arith.constant 1 : i32
    %0 = arith.muli %arg0, %c1_i32 : i32
    %1 = arith.addi %0, %arg1 : i32
    %c0_i32 = arith.constant 0 : i32
    %2 = arith.minsi %1, %c0_i32 : i32
    %c0_i32_0 = arith.constant 0 : i32
    %c0_i32_1 = arith.constant 0 : i32
    return %2, %c0_i32_0 : i32, i32
  }
  func.func @transform_1(%arg0: i32, %arg1: i32) -> (i32, i32, i32) {
    %c0_i32 = arith.constant 0 : i32
    %c0_i32_0 = arith.constant 0 : i32
    %c0_i32_1 = arith.constant 0 : i32
    return %arg0, %c0_i32, %c0_i32_0 : i32, i32, i32
  }
  func.func @transform_2(%arg0: i32, %arg1: i32) -> (i32, i32, i32) {
    %c0_i32 = arith.constant 0 : i32
    %c0_i32_0 = arith.constant 0 : i32
    %c0_i32_1 = arith.constant 0 : i32
    return %arg0, %c0_i32, %c0_i32_0 : i32, i32, i32
  }
}

</mosaic_0001>

<bundles_post_ra>
// kernel: tpu_custom_call.1
= control target key start
LH: loop header
LB: loop body
LE: loop exit
PB: predicated region body
PF: predicated region fallthrough
CT: control target
= control target key end

     0   :  { %8 = vsyncpa [#allocation3], 0  ;;  %s252_s0 = inlined_call_operand.hbm [shape: f32[16,128], index: 0, kind: input, shape index: {}]   ;;  %s253_s1 = inlined_call_operand.hbm [shape: f32[1,1,128], index: 1, kind: output, shape index: {0}]   ;;  %s254_s2 = inlined_call_operand.hbm [shape: f32[1,1,128], index: 2, kind: output, shape index: {1}]  }
   0x1   :  { %9 = vsyncpa [#allocation4], 0 }
   0x2   :  { %10 = vsyncpa [#allocation7], 0  ;;  %s187_s9 = smov [#allocation2]   ;;  %s115_s13 = scalar_lea.hbm %s252_s0, 256 }
   0x3   :  { %s22_s10 = sshll.u32 %s187_s9, 4  ;;  %p116_p0 = scmp.ne.s32.totalorder %s252_s0, %s115_s13  ;;  %s23_s10 = int_to_ptr.vmem [resolvable:$true] %s22_s10 }
   0x4   :  { %p119_p1 = scmp.lt.u32.totalorder %s115_s13, %s252_s0 }
   0x6   :  { %p121_p2 = pnand %p119_p1, %p116_p0 }
   0x8   :  { %124 = shalt.err (!%p121_p2)
}
   0x9   :  { %s125_s18 = scalar_lea.vmem %s23_s10, 256  ;;  %p130_p4 = scmp.lt.s32.totalorder %s23_s10, %s23_s10 }
   0xa   :  { %p126_p3 = scmp.ne.s32.totalorder %s23_s10, %s125_s18  ;;  %p131_p5 = scmp.lt.s32.totalorder %s125_s18, %s125_s18 }
   0xc   :  { %p132_p6 = por %p131_p5, %p130_p4 }
   0xe   :  { %p133_p7 = pnand %p132_p6, %p126_p3 }
  0x10   :  { %136 = shalt.err (!%p133_p7)
}
  0x11   :  { %s188_s19 = smov 128   ;;  %s189_s20 = smov 8  }
  0x12   :  { %28 = dma.hbm_to_vmem [thread:$0]  %s252_s0, 256, %s23_s10, [#allocation3], %s188_s19, %s188_s19, %s189_s20  }
  0x13   :  { %181 = dma.done.wait [#allocation3], 256  }
  0x14   :  { %182 = vsyncadd [#allocation3], 4294967040  ;;  %v190_v0 = vmov 0.0   ;;  %v42_v1 = vld [vmem:[#allocation2] sm:$0xff]  ;;  %v43_v2 = vld [vmem:[#allocation2 + $0x8] sm:$0xff]  ;;  %s191_s0 = smov [#allocation5]  }
  0x15   :  { %40 = vst [vmem:[#allocation5] sm:$0x1] %v190_v0  ;;  %41 = vst [vmem:[#allocation6] sm:$0x1] %v190_v0  ;;  %v57_v3 = vadd.f32 %v43_v2, %v42_v1  ;;  %v67_v4 = vmul.f32 %v42_v1, %v42_v1  ;;  %v68_v5 = vmul.f32 %v43_v2, %v43_v2  ;;  %s84_s23 = sshll.u32 %s191_s0, 4  ;;  %s192_s24 = smov [#allocation6]   ;;  %s85_s23 = int_to_ptr.vmem [resolvable:$true] %s84_s23 }
  0x16   :  { %s94_s25 = sshll.u32 %s192_s24, 4  ;;  %s137_s26 = scalar_lea.vmem %s85_s23, 16  ;;  %s220_s25 = int_to_ptr.vmem [resolvable:$true] %s94_s25 }
  0x17   :  { %v58_v6 = vrot.slane %v57_v3, 4  ;;  %v69_v7 = vadd.f32 %v68_v5, %v67_v4  ;;  %p138_p8 = scmp.ne.s32.totalorder %s85_s23, %s137_s26  ;;  %s141_s27 = scalar_lea.vmem %s85_s23, 32 }
  0x18   :  { %p142_p9 = scmp.lt.s32.totalorder %s85_s23, %s85_s23  ;;  %p143_p10 = scmp.lt.s32.totalorder %s141_s27, %s137_s26 }
  0x19   :  { %v59_v8 = vadd.f32 %v58_v6, %v57_v3  ;;  %v70_v9 = vrot.slane %v69_v7, 4 }
  0x1a   :  { %p144_p11 = por %p143_p10, %p142_p9 }
  0x1b   :  { %v60_v10 = vrot.slane %v59_v8, 2  ;;  %v71_v11 = vadd.f32 %v70_v9, %v69_v7 }
  0x1c   :  { %v56_v16 = vld [vmem:[#allocation5] sm:$0x1]  ;;  %v66_v19 = vld [vmem:[#allocation6] sm:$0x1]  ;;  %p145_p12 = pnand %p144_p11, %p138_p8 }
  0x1d   :  { %v61_v12 = vadd.f32 %v60_v10, %v59_v8  ;;  %v72_v13 = vrot.slane %v71_v11, 2 }
  0x1f   :  { %v62_v14 = vrot.slane %v61_v12, 1  ;;  %v73_v15 = vadd.f32 %v72_v13, %v71_v11 }
  0x21   :  { %v63_v17 = vadd.f32 %v62_v14, %v61_v12  ;;  %v74_v18 = vrot.slane %v73_v15, 1 }
  0x23   :  { %v64_v20 = vadd.f32 %v63_v17, %v56_v16  ;;  %v75_v21 = vadd.f32 %v74_v18, %v73_v15 }
  0x25   :  { %65 = vst [vmem:[#allocation5] sm:$0x1] %v64_v20  ;;  %v76_v22 = vadd.f32 %v75_v21, %v66_v19 }
  0x26   :  { %148 = shalt.err (!%p145_p12)
}
  0x27   :  { %s149_s30 = scalar_lea.hbm %s253_s1, 16 }
  0x28   :  { %p150_p13 = scmp.ne.s32.totalorder %s253_s1, %s149_s30  ;;  %p153_p0 = scmp.lt.u32.totalorder %s149_s30, %s253_s1 }
  0x2a   :  { %p155_p1 = pnand %p153_p0, %p150_p13 }
  0x2c   :  { %158 = shalt.err (!%p155_p1)
}
  0x2d   :  { %87 = dma.vmem_to_hbm [thread:$0]  %s85_s23, 16, %s253_s1, [#allocation4]   ;;  %77 = vst [vmem:[#allocation6] sm:$0x1] %v76_v22 }
  0x2e   :  { %s159_s9 = scalar_lea.vmem %s220_s25, 16  ;;  %s163_s10 = scalar_lea.vmem %s220_s25, 32 }
  0x2f   :  { %p160_p2 = scmp.ne.s32.totalorder %s220_s25, %s159_s9  ;;  %p164_p3 = scmp.lt.s32.totalorder %s220_s25, %s220_s25 }
  0x30   :  { %p165_p4 = scmp.lt.s32.totalorder %s163_s10, %s159_s9 }
  0x32   :  { %p166_p5 = por %p165_p4, %p164_p3 }
  0x34   :  { %p167_p6 = pnand %p166_p5, %p160_p2 }
  0x36   :  { %170 = shalt.err (!%p167_p6)
}
  0x37   :  { %s171_s13 = scalar_lea.hbm %s254_s2, 16 }
  0x38   :  { %p172_p7 = scmp.ne.s32.totalorder %s254_s2, %s171_s13  ;;  %p175_p8 = scmp.lt.u32.totalorder %s171_s13, %s254_s2 }
  0x3a   :  { %p177_p9 = pnand %p175_p8, %p172_p7 }
  0x3c   :  { %180 = shalt.err (!%p177_p9)
}
  0x3d   :  { %97 = dma.vmem_to_hbm [thread:$0]  %s220_s25, 16, %s254_s2, [#allocation7]  }
  0x3e   :  { %183 = dma.done.wait [#allocation4], 16  }
  0x3f   :  { %184 = vsyncadd [#allocation4], 4294967280 }
  0x40   :  { %185 = dma.done.wait [#allocation7], 16  }
  0x41   :  { %186 = vsyncadd [#allocation7], 4294967280 }
  0x42   :  { %104 = vsyncpa [#allocation3], 1 }
  0x43   :  { %105 = vsyncpa [#allocation4], 1 }
  0x44   :  { %106 = vsyncpa [#allocation7], 1 }

</bundles_post_ra>
